<compile_context>
chip_gen: v7x
topology: tpu7x:2x2x1
jax: 0.10.0
libtpu: 0.0.40
codegen_flags: <defaults>
</compile_context>

<pallas_src>
import functools

import jax
import jax.numpy as jnp
from jax.experimental import pallas as pl
from jax.experimental.pallas import tpu as pltpu


LANE = 128            # lane width: hidden/output feature dims padded to this
ROW_ALIGN = 16        # bf16 sublane packing: keep batch tiles a multiple of 16
MIN_MEGACORE_SPLIT = 256   # force >=2 grid steps once B >= 2*this (v7x megacore)
IN_FEATURES = 28 * 28
OUT_FEATURES = 10


def _round_up(n, m):
    return ((n + m - 1) // m) * m


def _cdiv(a, b):
    return -(-a // b)


# ---------------------------------------------------------------------------
# Fused MLP kernel: x -> (matmul + bias + act) * L, all inside one grid step.
# refs = (x_ref, w_0, b_0, w_1, b_1, ..., o_ref)
# ---------------------------------------------------------------------------
def _fused_mlp_kernel(*refs, activations, out_valid):
    x_ref = refs[0]
    o_ref = refs[-1]
    wb_refs = refs[1:-1]

    h = x_ref[...]                               # bf16 (tile, 784) MXU operand
    for i, act in enumerate(activations):
        w = wb_refs[2 * i][...]                  # bf16 (din_pad, dout_pad)
        b = wb_refs[2 * i + 1][...]              # f32  (1, dout_pad), padded lanes = 0
        # MXU matmul with bf16 operands and f32 accumulation; epilogue in f32.
        z = jnp.dot(h, w, preferred_element_type=jnp.float32) + b
        if act == "relu":
            h = jnp.maximum(z, 0.0).astype(jnp.bfloat16)
        elif act == "sigmoid":
            h = jax.nn.sigmoid(z).astype(jnp.bfloat16)
        elif act == "log_softmax":
            # Mask padded output lanes so they cannot corrupt the normalizer.
            # Large finite negative (not -inf) so the bf16 store stays clean.
            lane_ids = jax.lax.broadcasted_iota(jnp.int32, z.shape, 1)
            z = jnp.where(lane_ids < out_valid, z, -1e30)
            m = jnp.max(z, axis=-1, keepdims=True)       # XLU lane reduction
            s = z - m
            lse = jnp.log(jnp.sum(jnp.exp(s), axis=-1, keepdims=True))
            h = s - lse
        else:
            raise ValueError(act)
    o_ref[...] = h.astype(o_ref.dtype)


# ---------------------------------------------------------------------------
# Parameter init + packing.
# ---------------------------------------------------------------------------
def init_stdnet_params(key, layer_sizes):
    """Matches nn.Linear default init U(-1/sqrt(fan_in), +1/sqrt(fan_in)).

    Weights are stored transposed as (in, out) so the kernel computes x @ W + b.
    Returns unpadded f32 params (for the reference)."""
    params = []
    prev = IN_FEATURES
    for size in list(layer_sizes) + [OUT_FEATURES]:
        key, kw, kb = jax.random.split(key, 3)
        bound = 1.0 / jnp.sqrt(prev)
        w = jax.random.uniform(kw, (prev, size), jnp.float32, -bound, bound)
        b = jax.random.uniform(kb, (1, size), jnp.float32, -bound, bound)
        params.append((w, b))
        prev = size
    return params


def pack_params(params):
    """Pad output (lane) dims to 128; chain input dims to the previous padded
    output; layer 0 input stays at 784 (x is streamed unpadded).  Weights bf16,
    biases f32.  Zero padding keeps the math exact."""
    packed = []
    prev_pad = IN_FEATURES
    for w, b in params:
        din, dout = w.shape
        dout_p = _round_up(dout, LANE)
        w_p = jnp.zeros((prev_pad, dout_p), jnp.bfloat16)
        w_p = w_p.at[:din, :dout].set(w.astype(jnp.bfloat16))
        b_p = jnp.zeros((1, dout_p), jnp.float32).at[:, :dout].set(b)
        packed.append((w_p, b_p))
        prev_pad = dout_p
    return packed


# ---------------------------------------------------------------------------
# Forward wrapper: flatten -> bf16 -> batch-tiled single pallas_call -> slice.
# ---------------------------------------------------------------------------
def stdnet_forward(x_nchw, packed_params, sigmoid=False, batch_tile=1024):
    B = x_nchw.shape[0]
    # bf16 once, feature dim left at 784: halves the dominant HBM stream and
    # removes the old padded-f32 wrapper copy.
    x = x_nchw.reshape(B, IN_FEATURES).astype(jnp.bfloat16)

    dout_pad = packed_params[-1][0].shape[1]

    # Adaptive batch tiling:
    #  * tile derived from B so a ragged tail wastes < ROW_ALIGN rows per tile,
    #  * >= 2 grid steps for large batches so "parallel" can shard across
    #    v7x's two TensorCores.
    n_tiles = max(1, _cdiv(B, batch_tile))
    if B >= 2 * MIN_MEGACORE_SPLIT:
        n_tiles = max(n_tiles, 2)
    tile = _round_up(_cdiv(B, n_tiles), ROW_ALIGN)
    b_pad = n_tiles * tile

    if b_pad != B:
        x = jnp.pad(x, ((0, b_pad - B), (0, 0)))   # batch-only pad, no-op if aligned

    n_layers = len(packed_params)
    if sigmoid:
        activations = ("sigmoid",) * n_layers
    else:
        activations = ("relu",) * (n_layers - 1) + ("log_softmax",)

    kernel = functools.partial(
        _fused_mlp_kernel,
        activations=activations,
        out_valid=OUT_FEATURES,
    )

    # Activations stream through the grid; weights/biases have constant
    # index_maps so they are fetched once and stay VMEM-resident (~0.25 MB).
    in_specs = [pl.BlockSpec((tile, IN_FEATURES), lambda i: (i, 0))]
    flat_wb = []
    for w, b in packed_params:
        flat_wb += [w, b]
        in_specs.append(pl.BlockSpec(w.shape, lambda i: (0, 0)))
        in_specs.append(pl.BlockSpec(b.shape, lambda i: (0, 0)))

    out = pl.pallas_call(
        kernel,
        out_shape=jax.ShapeDtypeStruct((b_pad, dout_pad), jnp.bfloat16),
        grid=(n_tiles,),
        in_specs=in_specs,
        out_specs=pl.BlockSpec((tile, dout_pad), lambda i: (i, 0)),
        compiler_params=pltpu.CompilerParams(
            dimension_semantics=("parallel",),
        ),
    )(x, *flat_wb)

    return out[:B, :OUT_FEATURES]


# ---------------------------------------------------------------------------
# Plain-JAX references.
# ---------------------------------------------------------------------------
def _reference_forward(x_nchw, params, sigmoid=False, matmul_dtype=jnp.bfloat16):
    """Same math as the kernel (optionally same bf16 matmul operands)."""
    x = x_nchw.reshape(x_nchw.shape[0], IN_FEATURES).astype(jnp.float32)
    n = len(params)
    for i, (w, b) in enumerate(params):
        z = jnp.dot(x.astype(matmul_dtype), w.astype(matmul_dtype),
                    preferred_element_type=jnp.float32) + b
        if sigmoid:
            x = jax.nn.sigmoid(z)
        elif i < n - 1:
            x = jnp.maximum(z, 0.0)
        else:
            x = jax.nn.log_softmax(z, axis=1)
    return x


if __name__ == "__main__":
    key = jax.random.PRNGKey(0)
    k_x, k_p = jax.random.split(key)

    # Small shapes consistent with the module: MNIST-like input, args.layers="32"
    # -> layer sizes [784 -> 32, 32 -> 10].
    batch = 2
    x = jax.random.normal(k_x, (batch, 1, 28, 28), jnp.float32)
    params = init_stdnet_params(k_p, layer_sizes=[32])
    packed = pack_params(params)

    out = stdnet_forward(x, packed, sigmoid=False)
    out = jax.block_until_ready(out)
    assert out.shape == (batch, OUT_FEATURES)
    out_f32 = out.astype(jnp.float32)

    # Tight check vs. a reference using the same bf16-operand / f32-accum matmul
    # (kernel output is bf16, so allow its rounding).
    ref_bf16 = _reference_forward(x, params, sigmoid=False, matmul_dtype=jnp.bfloat16)
    assert jnp.allclose(out_f32, ref_bf16, atol=3e-2, rtol=3e-2)

    # Loose semantic check vs. the pure-f32 PyTorch-equivalent forward.
    ref_f32 = _reference_forward(x, params, sigmoid=False, matmul_dtype=jnp.float32)
    assert jnp.allclose(out_f32, ref_f32, atol=7e-2, rtol=7e-2)

    # Exercise multi-tile grid + ragged batch tail handling on a small case.
    batch2 = 40
    k_x2, _ = jax.random.split(k_x)
    x2 = jax.random.normal(k_x2, (batch2, 1, 28, 28), jnp.float32)
    out2 = jax.block_until_ready(stdnet_forward(x2, packed, sigmoid=False, batch_tile=16))
    ref2 = _reference_forward(x2, params, sigmoid=False, matmul_dtype=jnp.bfloat16)
    assert out2.shape == (batch2, OUT_FEATURES)
    assert jnp.allclose(out2.astype(jnp.float32), ref2, atol=3e-2, rtol=3e-2)

    # TODO(synk): sensitivity()/regularization()/set_regular_deriv()/dumps()/loads()
    # are training & serialization helpers with no forward-pass Pallas equivalent.
    print("KERNEL_OK")
</pallas_src>

<mosaic_0001>
module attributes {stable_mosaic.version = 11 : i64} {
  func.func @_fused_mlp_kernel(%arg0: i32, %arg1: memref<16x784xbf16, #tpu.memory_space<vmem>>, %arg2: memref<784x128xbf16, #tpu.memory_space<vmem>>, %arg3: memref<1x128xf32, #tpu.memory_space<vmem>>, %arg4: memref<128x128xbf16, #tpu.memory_space<vmem>>, %arg5: memref<1x128xf32, #tpu.memory_space<vmem>>, %arg6: memref<16x128xbf16, #tpu.memory_space<vmem>>) attributes {dimension_semantics = [#tpu.dimension_semantics<parallel>], iteration_bounds = array<i64: 1>, scalar_prefetch = 0 : i64, scratch_operands = 0 : i64, tpu.core_type = #tpu.core_type<tc>, window_params = [{transform_indices = @transform_0, window_bounds = array<i64: 16, 784>}, {pipeline_mode = #tpu.pipeline_mode<synchronous>, transform_indices = @transform_1, window_bounds = array<i64: 784, 128>}, {pipeline_mode = #tpu.pipeline_mode<synchronous>, transform_indices = @transform_2, window_bounds = array<i64: 1, 128>}, {pipeline_mode = #tpu.pipeline_mode<synchronous>, transform_indices = @transform_3, window_bounds = array<i64: 128, 128>}, {pipeline_mode = #tpu.pipeline_mode<synchronous>, transform_indices = @transform_4, window_bounds = array<i64: 1, 128>}, {transform_indices = @transform_5, window_bounds = array<i64: 16, 128>}]} {
    %c0 = arith.constant 0 : index
    %c0_0 = arith.constant 0 : index
    %0 = vector.load %arg1[%c0, %c0_0] : memref<16x784xbf16, #tpu.memory_space<vmem>>, vector<16x784xbf16>
    %c0_1 = arith.constant 0 : index
    %c0_2 = arith.constant 0 : index
    %1 = vector.load %arg2[%c0_1, %c0_2] : memref<784x128xbf16, #tpu.memory_space<vmem>>, vector<784x128xbf16>
    %c0_3 = arith.constant 0 : index
    %c0_4 = arith.constant 0 : index
    %2 = vector.load %arg3[%c0_3, %c0_4] : memref<1x128xf32, #tpu.memory_space<vmem>>, vector<1x128xf32>
    %cst = arith.constant dense<0.000000e+00> : vector<16x128xf32>
    %3 = tpu.matmul %0, %1, %cst {dimension_numbers = #tpu.dot_dimension_numbers<[1], [0], [0], [1], [0, 0, 1, 1], [], []>} : vector<16x784xbf16>, vector<784x128xbf16>, vector<16x128xf32> -> vector<16x128xf32>
    %4 = vector.broadcast %2 : vector<1x128xf32> to vector<16x128xf32>
    %5 = arith.addf %3, %4 : vector<16x128xf32>
    %cst_5 = arith.constant 0.000000e+00 : f32
    %6 = vector.broadcast %cst_5 : f32 to vector<16x128xf32>
    %7 = arith.maximumf %5, %6 : vector<16x128xf32>
    %8 = arith.truncf %7 : vector<16x128xf32> to vector<16x128xbf16>
    %c0_6 = arith.constant 0 : index
    %c0_7 = arith.constant 0 : index
    %9 = vector.load %arg4[%c0_6, %c0_7] : memref<128x128xbf16, #tpu.memory_space<vmem>>, vector<128x128xbf16>
    %c0_8 = arith.constant 0 : index
    %c0_9 = arith.constant 0 : index
    %10 = vector.load %arg5[%c0_8, %c0_9] : memref<1x128xf32, #tpu.memory_space<vmem>>, vector<1x128xf32>
    %cst_10 = arith.constant dense<0.000000e+00> : vector<16x128xf32>
    %11 = tpu.matmul %8, %9, %cst_10 {dimension_numbers = #tpu.dot_dimension_numbers<[1], [0], [0], [1], [0, 0, 1, 1], [], []>} : vector<16x128xbf16>, vector<128x128xbf16>, vector<16x128xf32> -> vector<16x128xf32>
    %12 = vector.broadcast %10 : vector<1x128xf32> to vector<16x128xf32>
    %13 = arith.addf %11, %12 : vector<16x128xf32>
    %14 = tpu.iota {dimensions = array<i32: 1>} : vector<16x128xi32>
    %c10_i32 = arith.constant 10 : i32
    %15 = vector.broadcast %c10_i32 : i32 to vector<16x128xi32>
    %16 = arith.cmpi slt, %14, %15 : vector<16x128xi32>
    %cst_11 = arith.constant -1.000000e+30 : f32
    %17 = vector.broadcast %cst_11 : f32 to vector<16x128xf32>
    %18 = arith.select %16, %13, %17 : vector<16x128xi1>, vector<16x128xf32>
    %cst_12 = arith.constant dense<0xFF800000> : vector<16xf32>
    %19 = vector.multi_reduction <maximumf>, %18, %cst_12 [1] : vector<16x128xf32> to vector<16xf32>
    %20 = vector.shape_cast %19 : vector<16xf32> to vector<16x1xf32>
    %21 = vector.broadcast %20 : vector<16x1xf32> to vector<16x128xf32>
    %22 = arith.subf %18, %21 : vector<16x128xf32>
    %23 = math.exp %22 : vector<16x128xf32>
    %cst_13 = arith.constant dense<0.000000e+00> : vector<16xf32>
    %24 = vector.multi_reduction <add>, %23, %cst_13 [1] : vector<16x128xf32> to vector<16xf32>
    %25 = vector.shape_cast %24 : vector<16xf32> to vector<16x1xf32>
    %26 = math.log %25 : vector<16x1xf32>
    %27 = vector.broadcast %26 : vector<16x1xf32> to vector<16x128xf32>
    %28 = arith.subf %22, %27 : vector<16x128xf32>
    %29 = arith.truncf %28 : vector<16x128xf32> to vector<16x128xbf16>
    %c0_14 = arith.constant 0 : index
    %c0_15 = arith.constant 0 : index
    %30 = vector.load %arg6[%c0_14, %c0_15] : memref<16x128xbf16, #tpu.memory_space<vmem>>, vector<16x128xbf16>
    tpu.vector_store %arg6[%c0_14, %c0_15], %29 {strides = array<i32>} : memref<16x128xbf16, #tpu.memory_space<vmem>>, vector<16x128xbf16>,
    return
  }
  func.func @transform_0(%arg0: i32) -> (i32, i32) {
    %c0_i32 = arith.constant 0 : i32
    %c0_i32_0 = arith.constant 0 : i32
    return %arg0, %c0_i32 : i32, i32
  }
  func.func @transform_1(%arg0: i32) -> (i32, i32) {
    %c0_i32 = arith.constant 0 : i32
    %c0_i32_0 = arith.constant 0 : i32
    %c0_i32_1 = arith.constant 0 : i32
    return %c0_i32, %c0_i32_0 : i32, i32
  }
  func.func @transform_2(%arg0: i32) -> (i32, i32) {
    %c0_i32 = arith.constant 0 : i32
    %c0_i32_0 = arith.constant 0 : i32
    %c0_i32_1 = arith.constant 0 : i32
    return %c0_i32, %c0_i32_0 : i32, i32
  }
  func.func @transform_3(%arg0: i32) -> (i32, i32) {
    %c0_i32 = arith.constant 0 : i32
    %c0_i32_0 = arith.constant 0 : i32
    %c0_i32_1 = arith.constant 0 : i32
    return %c0_i32, %c0_i32_0 : i32, i32
  }
  func.func @transform_4(%arg0: i32) -> (i32, i32) {
    %c0_i32 = arith.constant 0 : i32
    %c0_i32_0 = arith.constant 0 : i32
    %c0_i32_1 = arith.constant 0 : i32
    return %c0_i32, %c0_i32_0 : i32, i32
  }
  func.func @transform_5(%arg0: i32) -> (i32, i32) {
    %c0_i32 = arith.constant 0 : i32
    %c0_i32_0 = arith.constant 0 : i32
    return %arg0, %c0_i32 : i32, i32
  }
}

</mosaic_0001>

<bundles_post_ra>
// kernel: tpu_custom_call.1
= control target key start
LH: loop header
LB: loop body
LE: loop exit
PB: predicated region body
PF: predicated region fallthrough
CT: control target
= control target key end

     0   :  { %10 = vsyncpa [#allocation3], 0  ;;  %s1315_s0 = inlined_call_operand.hbm [shape: bf16[16,784], index: 0, kind: input, shape index: {}]   ;;  %s1316_s1 = inlined_call_operand.hbm [shape: bf16[784,128], index: 1, kind: input, shape index: {}]   ;;  %s1317_s2 = inlined_call_operand.vmem [shape: f32[1,128], index: 2, kind: input, shape index: {}]   ;;  %s1318_s3 = inlined_call_operand.hbm [shape: bf16[128,128], index: 3, kind: input, shape index: {}]   ;;  %s1319_s4 = inlined_call_operand.vmem [shape: f32[1,128], index: 4, kind: input, shape index: {}]   ;;  %s1320_s5 = inlined_call_operand.hbm [shape: bf16[16,128], index: 5, kind: output, shape index: {}]  }
   0x1   :  { %11 = vsyncpa [#allocation6], 0 }
   0x2   :  { %12 = vsyncpa [#allocation4], 0  ;;  %s1199_s18 = smov [#allocation5]   ;;  %s1105_s22 = scalar_lea.hbm %s1316_s1, 6272 }
   0x3   :  { %s30_s19 = sshll.u32 %s1199_s18, 4  ;;  %p1106_p0 = scmp.ne.s32.totalorder %s1316_s1, %s1105_s22  ;;  %s31_s19 = int_to_ptr.vmem [resolvable:$true] %s30_s19 }
   0x4   :  { %p1109_p1 = scmp.lt.u32.totalorder %s1105_s22, %s1316_s1 }
   0x6   :  { %p1111_p2 = pnand %p1109_p1, %p1106_p0 }
   0x8   :  { %1114 = shalt.err (!%p1111_p2)
}
   0x9   :  { %s1115_s27 = scalar_lea.vmem %s31_s19, 6272  ;;  %p1120_p4 = scmp.lt.s32.totalorder %s31_s19, %s31_s19 }
   0xa   :  { %p1116_p3 = scmp.ne.s32.totalorder %s31_s19, %s1115_s27  ;;  %p1121_p5 = scmp.lt.s32.totalorder %s1115_s27, %s1115_s27 }
   0xc   :  { %p1122_p6 = por %p1121_p5, %p1120_p4 }
   0xe   :  { %p1123_p7 = pnand %p1122_p6, %p1116_p3 }
  0x10   :  { %1126 = shalt.err (!%p1123_p7)
}
  0x11   :  { %s1200_s28 = smov 64   ;;  %s1201_s29 = smov 4  }
  0x12   :  { %36 = dma.hbm_to_vmem [thread:$0]  %s1316_s1, 6272, %s31_s19, [#allocation6], %s1200_s28, %s1200_s28, %s1201_s29  }
  0x13   :  { %s1202_s7 = smov [#allocation2]   ;;  %s1127_s11 = scalar_lea.hbm %s1315_s0, 896 }
  0x14   :  { %s18_s8 = sshll.u32 %s1202_s7, 4  ;;  %p1128_p8 = scmp.ne.s32.totalorder %s1315_s0, %s1127_s11  ;;  %s19_s8 = int_to_ptr.vmem [resolvable:$true] %s18_s8 }
  0x15   :  { %p1131_p9 = scmp.lt.u32.totalorder %s1127_s11, %s1315_s0 }
  0x17   :  { %p1133_p10 = pnand %p1131_p9, %p1128_p8 }
  0x19   :  { %1136 = shalt.err (!%p1133_p10)
}
  0x1a   :  { %s1137_s16 = scalar_lea.vmem %s19_s8, 896  ;;  %p1142_p12 = scmp.lt.s32.totalorder %s19_s8, %s19_s8 }
  0x1b   :  { %p1138_p11 = scmp.ne.s32.totalorder %s19_s8, %s1137_s16  ;;  %p1143_p13 = scmp.lt.s32.totalorder %s1137_s16, %s1137_s16 }
  0x1d   :  { %p1144_p0 = por %p1143_p13, %p1142_p12 }
  0x1f   :  { %p1145_p1 = pnand %p1144_p0, %p1138_p11 }
  0x21   :  { %1148 = shalt.err (!%p1145_p1)
}
  0x22   :  { %s1203_s1 = smov 448   ;;  %s1204_s17 = smov 28  }
  0x23   :  { %24 = dma.hbm_to_vmem [thread:$0]  %s1315_s0, 896, %s19_s8, [#allocation3], %s1203_s1, %s1203_s1, %s1204_s17  }
  0x24   :  { %s1205_s20 = smov [#allocation7]   ;;  %s1149_s24 = scalar_lea.hbm %s1318_s3, 1024 }
  0x25   :  { %s44_s21 = sshll.u32 %s1205_s20, 4  ;;  %p1150_p2 = scmp.ne.s32.totalorder %s1318_s3, %s1149_s24  ;;  %s45_s21 = int_to_ptr.vmem [resolvable:$true] %s44_s21 }
  0x26   :  { %p1153_p3 = scmp.lt.u32.totalorder %s1149_s24, %s1318_s3 }
  0x28   :  { %p1155_p4 = pnand %p1153_p3, %p1150_p2 }
  0x2a   :  { %1158 = shalt.err (!%p1155_p4)
}
  0x2b   :  { %s1159_s6 = scalar_lea.vmem %s45_s21, 1024  ;;  %p1164_p6 = scmp.lt.s32.totalorder %s45_s21, %s45_s21 }
  0x2c   :  { %p1160_p5 = scmp.ne.s32.totalorder %s45_s21, %s1159_s6  ;;  %p1165_p7 = scmp.lt.s32.totalorder %s1159_s6, %s1159_s6 }
  0x2e   :  { %p1166_p8 = por %p1165_p7, %p1164_p6 }
  0x30   :  { %p1167_p9 = pnand %p1166_p8, %p1160_p5 }
  0x32   :  { %1170 = shalt.err (!%p1167_p9)
}
  0x33   :  { %50 = dma.hbm_to_vmem [thread:$0]  %s1318_s3, 1024, %s45_s21, [#allocation6], %s1200_s28, %s1200_s28, %s1201_s29  }
  0x34   :  { %1193 = dma.done.wait [#allocation3], 896  }
  0x35   :  { %1194 = vsyncadd [#allocation3], 4294966400 }
  0x36   :  { %1195 = dma.done.wait [#allocation6], 7296  }
  0x37   :  { %1196 = vsyncadd [#allocation6], 4294960000  ;;  %v1030_v0 = vld [vmem:[#allocation5 + $0x40] sm:$0xff]   ;;  %v1034_v4 = vld [vmem:[#allocation5 + $0x48] sm:$0xff]   ;;  %v1206_v38 = vmov 0.0   ;;  %vm1207_vm0 = vmmov 0  }
  0x38   :  { %v1031_v1 = vld [vmem:[#allocation5] sm:$0xff]   ;;  %917 = vmatprep.subr.bf16.mxu0 %v1030_v0  ;;  %v1035_v5 = vld [vmem:[#allocation5 + $0x8] sm:$0xff]   ;;  %v1038_v8 = vld [vmem:[#allocation5 + $0x50] sm:$0xff]   ;;  %vm505_vm1 = vcmask 130048  }
  0x39   :  { %v1032_v2 = vld [vmem:[#allocation5 + $0xc0] sm:$0xff]   ;;  %918 = vmatpush3.bf16.msra.mxu0 %v1031_v1  ;;  %v1036_v6 = vld [vmem:[#allocation5 + $0xc8] sm:$0xff]   ;;  %v1039_v9 = vld [vmem:[#allocation5 + $0x10] sm:$0xff]  }
  0x3a   :  { %v1033_v3 = vld [vmem:[#allocation5 + $0x80] sm:$0xff]   ;;  %939 = vmatprep.subr.bf16.mxu1 %v1032_v2  ;;  %919 = vmatprep.subr.bf16.mxu0 %v1034_v4  ;;  %v1037_v7 = vld [vmem:[#allocation5 + $0x88] sm:$0xff]   ;;  %v1040_v10 = vld [vmem:[#allocation5 + $0xd0] sm:$0xff]  }
  0x3b   :  { %940 = vmatpush3.bf16.msra.mxu1 %v1033_v3  ;;  %v1041_v11 = vld [vmem:[#allocation5 + $0x90] sm:$0xff]   ;;  %v1042_v12 = vld [vmem:[#allocation5 + $0x58] sm:$0xff]   ;;  %v1046_v16 = vld [vmem:[#allocation5 + $0x60] sm:$0xff]  }
  0x3c   :  { %941 = vmatprep.subr.bf16.mxu1 %v1036_v6  ;;  %v1043_v13 = vld [vmem:[#allocation5 + $0x18] sm:$0xff]   ;;  %v1047_v17 = vld [vmem:[#allocation5 + $0x20] sm:$0xff]   ;;  %v1050_v20 = vld [vmem:[#allocation5 + $0x68] sm:$0xff]  }
  0x3d   :  { %920 = vmatpush3.bf16.msra.mxu0 %v1035_v5  ;;  %v1044_v14 = vld [vmem:[#allocation5 + $0xd8] sm:$0xff]   ;;  %v1048_v18 = vld [vmem:[#allocation5 + $0xe0] sm:$0xff]   ;;  %v1051_v21 = vld [vmem:[#allocation5 + $0x28] sm:$0xff]  }
  0x3e   :  { %921 = vmatprep.subr.bf16.mxu0 %v1038_v8  ;;  %v1045_v15 = vld [vmem:[#allocation5 + $0x98] sm:$0xff]   ;;  %v1049_v19 = vld [vmem:[#allocation5 + $0xa0] sm:$0xff]   ;;  %v1052_v22 = vld [vmem:[#allocation5 + $0xe8] sm:$0xff]  }
  0x3f   :  { %942 = vmatpush3.bf16.msra.mxu1 %v1037_v7  ;;  %v1053_v23 = vld [vmem:[#allocation5 + $0xa8] sm:$0xff]   ;;  %v1054_v24 = vld [vmem:[#allocation5 + $0x70] sm:$0xff]   ;;  %v1058_v28 = vld [vmem:[#allocation5 + $0x78] sm:$0xff]  }
  0x40   :  { %943 = vmatprep.subr.bf16.mxu1 %v1040_v10  ;;  %v1055_v25 = vld [vmem:[#allocation5 + $0x30] sm:$0xff]   ;;  %v1059_v29 = vld [vmem:[#allocation5 + $0x38] sm:$0xff]   ;;  %v1061_v31 = vld [vmem:[#allocation2] ss:$28 sps:$4 sm:$0xff]  }
  0x41   :  { %922 = vmatpush3.bf16.msra.mxu0 %v1039_v9  ;;  %v1056_v26 = vld [vmem:[#allocation5 + $0xf0] sm:$0xff]   ;;  %v1060_v30 = vld [vmem:[#allocation5 + $0xf8] sm:$0xff]   ;;  %v1063_v32 = vld [vmem:[#allocation2 + $0x4] ss:$28 sps:$4 sm:$0xff]  }
  0x42   :  { %923 = vmatprep.subr.bf16.mxu0 %v1042_v12  ;;  %v1057_v27 = vld [vmem:[#allocation5 + $0xb0] sm:$0xff]   ;;  %v1064_v33 = vld [vmem:[#allocation5 + $0xb8] sm:$0xff]   ;;  %541 = vmatprep.mubr.bf16.mxu0 %v1063_v32  ;;  %v1065_v34 = vld [vmem:[#allocation5 + $0x140] sm:$0xff]  }
  0x43   :  { %944 = vmatpush3.bf16.msra.mxu1 %v1041_v11  ;;  %v1066_v35 = vld [vmem:[#allocation2 + $0x8] ss:$28 sps:$4 sm:$0xff]   ;;  %v1069_v37 = vld [vmem:[#allocation5 + $0x100] sm:$0xff]   ;;  %v1074_v43 = vld [vmem:[#allocation5 + $0x158] sm:$0xff]  }
  0x44   :  { %945 = vmatprep.subr.bf16.mxu1 %v1044_v14  ;;  %v1068_v36 = vld [vmem:[#allocation2 + $0xc] ss:$28 sps:$4 sm:$0xff]   ;;  %v1070_v39 = vld [vmem:[#allocation5 + $0x148] sm:$0xff]   ;;  %v1075_v44 = vld [vmem:[#allocation5 + $0x118] sm:$0xff]  }
  0x45   :  { %924 = vmatpush3.bf16.msra.mxu0 %v1043_v13  ;;  %582 = vmatprep.mubr.bf16.mxu1 %v1068_v36  ;;  %v1071_v40 = vld [vmem:[#allocation5 + $0x108] sm:$0xff]   ;;  %v1072_v41 = vld [vmem:[#allocation5 + $0x150] sm:$0xff]   ;;  %v1076_v45 = vld [vmem:[#allocation5 + $0x160] sm:$0xff]  }
  0x46   :  { %925 = vmatprep.subr.bf16.mxu0 %v1046_v16  ;;  %v1073_v42 = vld [vmem:[#allocation5 + $0x110] sm:$0xff]   ;;  %v1077_v46 = vld [vmem:[#allocation5 + $0x120] sm:$0xff]   ;;  %v1078_v47 = vld [vmem:[#allocation5 + $0x168] sm:$0xff]  }
  0x47   :  { %946 = vmatpush3.bf16.msra.mxu1 %v1045_v15  ;;  %v1084_v48 = vld [vmem:[#allocation5 + $0x180] sm:$0xff]   ;;  %v1079_v49 = vld [vmem:[#allocation5 + $0x128] sm:$0xff]   ;;  %v1087_v50 = vld [vmem:[#allocation2 + $0x14] ss:$28 sps:$4 sm:$0xff]  }
  0x48   :  { %947 = vmatprep.subr.bf16.mxu1 %v1048_v18  ;;  %v1080_v51 = vld [vmem:[#allocation5 + $0x170] sm:$0xff]   ;;  %v1088_v52 = vld [vmem:[#allocation2 + $0x18] ss:$28 sps:$4 sm:$0xff]   ;;  %v1089_v57 = vld [vmem:[#allocation7] sm:$0xff]  }
  0x49   :  { %926 = vmatpush3.bf16.msra.mxu0 %v1047_v17  ;;  %v1081_v53 = vld [vmem:[#allocation5 + $0x130] sm:$0xff]   ;;  %v1082_v54 = vld [vmem:[#allocation5 + $0x178] sm:$0xff]   ;;  %v1092_v60 = vld [vmem:[#allocation7 + $0x18] sm:$0xff]  }
  0x4a   :  { %927 = vmatprep.subr.bf16.mxu0 %v1050_v20  ;;  %v1083_v55 = vld [vmem:[#allocation5 + $0x138] sm:$0xff]   ;;  %v1090_v58 = vld [vmem:[#allocation7 + $0x8] sm:$0xff]   ;;  %v1093_v61 = vld [vmem:[#allocation7 + $0x20] sm:$0xff]  }
  0x4b   :  { %948 = vmatpush3.bf16.msra.mxu1 %v1049_v19  ;;  %v1085_v56 = vld [vmem:[#allocation2 + $0x10] ss:$28 sps:$4 sm:$0xff]   ;;  %v1096_v0 = vld [vmem:[#allocation7 + $0x38] sm:$0xff]   ;;  %v841_v2 = vld [vmem:[%s1317_s2] ss:$0 sm:$0xff] }
  0x4c   :  { %949 = vmatprep.subr.bf16.mxu1 %v1052_v22  ;;  %v1091_v59 = vld [vmem:[#allocation7 + $0x10] sm:$0xff]   ;;  %v1094_v62 = vld [vmem:[#allocation7 + $0x28] sm:$0xff]  }
  0x4d   :  { %928 = vmatpush3.bf16.msra.mxu0 %v1051_v21  ;;  %v1095_v63 = vld [vmem:[#allocation7 + $0x30] sm:$0xff]  }
  0x4e   :  { %929 = vmatprep.subr.bf16.mxu0 %v1054_v24 }
  0x4f   :  { %950 = vmatpush3.bf16.msra.mxu1 %v1053_v23 }
  0x50   :  { %951 = vmatprep.subr.bf16.mxu1 %v1056_v26 }
  0x51   :  { %930 = vmatpush3.bf16.msra.mxu0 %v1055_v25 }
  0x52   :  { %931 = vmatprep.subr.bf16.mxu0 %v1058_v28 }
  0x53   :  { %952 = vmatpush3.bf16.msra.mxu1 %v1057_v27 }
  0x54   :  { %953 = vmatprep.subr.bf16.mxu1 %v1060_v30 }
  0x55   :  { %932 = vmatpush3.bf16.msra.mxu0 %v1059_v29 }
  0x56   :  { %961 = vmatprep.subr.bf16.mxu0 %v1065_v34 }
  0x57   :  { %954 = vmatpush3.bf16.msra.mxu1 %v1064_v33 }
  0x58   :  { %542 = vmatmul.mubr.bf16.vlgmr.msra.gmra.mrb[0].mxu0 %v1061_v31  ;;  %994 = vmatprep.subr.bf16.mxu1 %v1206_v38 }
  0x59   :  { %962 = vmatpush3.bf16.msra.mxu0 %v1069_v37  ;;  %623 = vmatprep.mubr.bf16.mxu0 %v1087_v50  ;;  %v899_v37 = vld [vmem:[%s1319_s4] ss:$0 sm:$0xff]  ;;  %s1208_s4 = smov [#allocation8]  }
  0x5a   :  { %583 = vmatmul.mubr.bf16.vlgmr.msra.gmra.mrb[0].mxu1 %v1066_v35  ;;  %963 = vmatprep.subr.bf16.mxu0 %v1070_v39  ;;  %v788_v35 = vlaneseq  ;;  %s828_s10 = sshll.u32 %s1208_s4, 4  ;;  %s829_s10 = int_to_ptr.vmem [resolvable:$true] %s828_s10 }
  0x5b   :  { %996 = vmatprep.mubr.msk.bf16.mxu1 %vm1207_vm0, %v1206_v38  ;;  %995 = vmatpush3.bf16.msra.mxu1 %v1084_v48  ;;  %s1171_s11 = scalar_lea.vmem %s829_s10, 128  ;;  %p1176_p11 = scmp.lt.s32.totalorder %s829_s10, %s829_s10 }
  0x5c   :  { %1000 = vmatprep.subr.bf16.mxu1 %v1206_v38  ;;  %v789_v36 = vand.u32 127, %v788_v35  ;;  %p1172_p10 = scmp.ne.s32.totalorder %s829_s10, %s1171_s11  ;;  %p1177_p12 = scmp.lt.s32.totalorder %s1171_s11, %s1171_s11 }
  0x5d   :  { %964 = vmatpush3.bf16.msra.mxu0 %v1071_v40 }
  0x5e   :  { %965 = vmatprep.subr.bf16.mxu0 %v1072_v41  ;;  %vm790_vm2 = vcmp.lt.s32.totalorder %v789_v36, 10  ;;  %p1178_p13 = por %p1177_p12, %p1176_p11 }
  0x60   :  { %p1179_p0 = pnand %p1178_p13, %p1172_p10 }
  0x61   :  { %966 = vmatpush3.bf16.msra.mxu0 %v1073_v42 }
  0x62   :  { %967 = vmatprep.subr.bf16.mxu0 %v1074_v43  ;;  %997 = vmatmul.mubr.msk.bf16.vlgmr.msra.gmra.mrb[4].mxu1 %vm505_vm1, %v1088_v52 }
  0x63   :  { %1016 = vmatprep.mubr.msk.bf16.mxu1 %vm1207_vm0, %v1206_v38  ;;  %1001 = vmatpush3.bf16.msra.mxu1 %v1089_v57 }
  0x64   :  { %1002 = vmatprep.subr.bf16.mxu1 %v1206_v38 }
  0x65   :  { %968 = vmatpush3.bf16.msra.mxu0 %v1075_v44 }
  0x66   :  { %969 = vmatprep.subr.bf16.mxu0 %v1076_v45 }
  0x67   :  { %1003 = vmatpush3.bf16.msra.mxu1 %v1090_v58 }
  0x68   :  { %1004 = vmatprep.subr.bf16.mxu1 %v1206_v38 }
  0x69   :  { %970 = vmatpush3.bf16.msra.mxu0 %v1077_v46 }
  0x6a   :  { %971 = vmatprep.subr.bf16.mxu0 %v1078_v47 }
  0x6b   :  { %1005 = vmatpush3.bf16.msra.mxu1 %v1091_v59 }
  0x6c   :  { %1006 = vmatprep.subr.bf16.mxu1 %v1206_v38 }
  0x6d   :  { %972 = vmatpush3.bf16.msra.mxu0 %v1079_v49 }
  0x6e   :  { %973 = vmatprep.subr.bf16.mxu0 %v1080_v51 }
  0x6f   :  { %1007 = vmatpush3.bf16.msra.mxu1 %v1092_v60 }
  0x70   :  { %1008 = vmatprep.subr.bf16.mxu1 %v1206_v38 }
  0x71   :  { %974 = vmatpush3.bf16.msra.mxu0 %v1081_v53 }
  0x72   :  { %975 = vmatprep.subr.bf16.mxu0 %v1082_v54 }
  0x73   :  { %1009 = vmatpush3.bf16.msra.mxu1 %v1093_v61 }
  0x74   :  { %1010 = vmatprep.subr.bf16.mxu1 %v1206_v38 }
  0x75   :  { %976 = vmatpush3.bf16.msra.mxu0 %v1083_v55 }
  0x77   :  { %1011 = vmatpush3.bf16.msra.mxu1 %v1094_v62 }
  0x78   :  { %624 = vmatmul.mubr.bf16.vlgmr.msra.gmra.mrb[4].mxu0 %v1085_v56  ;;  %1012 = vmatprep.subr.bf16.mxu1 %v1206_v38 }
  0x7b   :  { %1013 = vmatpush3.bf16.msra.mxu1 %v1095_v63 }
  0x7c   :  { %1014 = vmatprep.subr.bf16.mxu1 %v1206_v38 }
  0x7f   :  { %1015 = vmatpush3.bf16.msra.mxu1 %v1096_v0 }
 0x12b   :  { %v933_v1 = vpop.f32.mrb[0].mxu0 }
 0x12c   :  { %v934_v3 = vpop.f32.mrb[1].mxu0 }
 0x12d   :  { %v935_v4 = vadd.f32 %v934_v3, %v933_v1  ;;  %v936_v5 = vpop.f32.mrb[2].mxu0  ;;  %v955_v6 = vpop.f32.mrb[0].mxu1 }
 0x12e   :  { %v937_v7 = vpop.f32.mrb[3].mxu0  ;;  %v956_v10 = vpop.f32.mrb[1].mxu1 }
 0x12f   :  { %v544_v8 = vadd.f32 %v935_v4, %v841_v2  ;;  %v938_v9 = vadd.f32 %v937_v7, %v936_v5  ;;  %v957_v11 = vadd.f32 %v956_v10, %v955_v6  ;;  %v958_v12 = vpop.f32.mrb[2].mxu1 }
 0x130   :  { %v959_v14 = vpop.f32.mrb[3].mxu1 }
 0x131   :  { %v547_v13 = vadd.f32 %v938_v9, %v841_v2  ;;  %v585_v15 = vadd.f32 %v957_v11, %v544_v8  ;;  %v960_v16 = vadd.f32 %v959_v14, %v958_v12 }
 0x133   :  { %v588_v17 = vadd.f32 %v960_v16, %v547_v13 }
 0x135   :  { %v666_v18 = vpop.f32.mrb[4].mxu1 }
 0x136   :  { %v998_v19 = vpop.f32.mrb[5].mxu1 }
 0x137   :  { %v669_v20 = vpop.f32.mrb[6].mxu1 }
 0x138   :  { %v999_v21 = vpop.f32.mrb[7].mxu1 }
 0x14b   :  { %v977_v22 = vpop.f32.mrb[4].mxu0 }
 0x14c   :  { %v978_v23 = vpop.f32.mrb[5].mxu0 }
 0x14d   :  { %v979_v24 = vadd.f32 %v978_v23, %v977_v22  ;;  %v980_v25 = vpop.f32.mrb[6].mxu0 }
 0x14e   :  { %v981_v26 = vpop.f32.mrb[7].mxu0 }
 0x14f   :  { %v626_v27 = vadd.f32 %v979_v24, %v585_v15  ;;  %v982_v28 = vadd.f32 %v981_v26, %v980_v25 }
 0x151   :  { %v667_v29 = vadd.f32 %v666_v18, %v626_v27  ;;  %v629_v30 = vadd.f32 %v982_v28, %v588_v17 }
 0x153   :  { %v670_v31 = vadd.f32 %v669_v20, %v629_v30  ;;  %v673_v32 = vmax.f32 %v667_v29, 0.0 }
 0x155   :  { %v674_v33 = vmax.f32 %v670_v31, 0.0 }
 0x157   :  { %v675_v34 = vpack.c.bf16 %v674_v33, %v673_v32 }
 0x159   :  { %1017 = vmatmul.mubr.bf16.vlgmr.msra.gmra.mrb[8].mxu1 %v675_v34 }
 0x22c   :  { %v781_v38 = vpop.f32.mrb[8].mxu1 }
 0x22d   :  { %v782_v39 = vadd.f32 %v899_v37, %v781_v38  ;;  %v1018_v40 = vpop.f32.mrb[9].mxu1 }
 0x22e   :  { %v784_v41 = vpop.f32.mrb[10].mxu1 }
 0x22f   :  { %v785_v42 = vadd.f32 %v899_v37, %v784_v41  ;;  %v1019_v43 = vpop.f32.mrb[11].mxu1  ;;  %v791_v44 = vsel %vm790_vm2, %v782_v39, -1e+30 }
 0x230   :  { %793 = vmax.xlane.f32.xlu0 %v791_v44 }
 0x231   :  { %v792_v45 = vsel %vm790_vm2, %v785_v42, -1e+30 }
 0x234   :  { %795 = vmax.xlane.f32.xlu0 %v792_v45 }
 0x2bd   :  { %v794_v46 = vpop.xlane.xlu0 %793 }
 0x2be   :  { %v797_v47 = vsub.f32 %v791_v44, %v794_v46 }
 0x2c0   :  { %v799_v48 = vmul.f32 1.442695, %v797_v47 }
 0x2c1   :  { %v796_v49 = vpop.xlane.xlu0 %795 }
 0x2c2   :  { %v798_v50 = vsub.f32 %v792_v45, %v796_v49  ;;  %1097 = vpow2.f32 %v799_v48 }
 0x2c4   :  { %v801_v51 = vmul.f32 1.442695, %v798_v50 }
 0x2c6   :  { %1099 = vpow2.f32 %v801_v51 }
 0x2cc   :  { %v1098_v52 = vpop.eup %1097 }
 0x2cd   :  { %803 = vadd.xlane.f32.xlu1 %v1098_v52 }
 0x2d0   :  { %v1100_v53 = vpop.eup %1099 }
 0x2d1   :  { %805 = vadd.xlane.f32.xlu1 %v1100_v53 }
 0x35a   :  { %v804_v54 = vpop.xlane.xlu1 %803 }
 0x35b   :  { %1101 = vlog2.f32 %v804_v54 }
 0x35e   :  { %v806_v55 = vpop.xlane.xlu1 %805 }
 0x35f   :  { %1103 = vlog2.f32 %v806_v55 }
 0x365   :  { %v1102_v56 = vpop.eup %1101 }
 0x366   :  { %v808_v57 = vmul.f32 0.6931472, %v1102_v56 }
 0x368   :  { %v811_v60 = vsub.f32 %v797_v47, %v808_v57 }
 0x369   :  { %v1104_v58 = vpop.eup %1103 }
 0x36a   :  { %v810_v59 = vmul.f32 0.6931472, %v1104_v58 }
 0x36c   :  { %v812_v61 = vsub.f32 %v798_v50, %v810_v59 }
 0x36e   :  { %v915_v62 = vpack.c.bf16 %v812_v61, %v811_v60 }
 0x370   :  { %916 = vst [vmem:[#allocation8] sm:$0xff] %v915_v62  }
 0x371   :  { %1182 = shalt.err (!%p1179_p0)
}
 0x372   :  { %s1183_s14 = scalar_lea.hbm %s1320_s5, 128 }
 0x373   :  { %p1184_p1 = scmp.ne.s32.totalorder %s1320_s5, %s1183_s14  ;;  %p1187_p2 = scmp.lt.u32.totalorder %s1183_s14, %s1320_s5 }
 0x375   :  { %p1189_p3 = pnand %p1187_p2, %p1184_p1 }
 0x377   :  { %1192 = shalt.err (!%p1189_p3)
}
 0x378   :  { %834 = dma.vmem_to_hbm [thread:$0]  %s829_s10, 128, %s1320_s5, [#allocation4], %s1200_s28, %s1200_s28, %s1201_s29  }
 0x379   :  { %1197 = dma.done.wait [#allocation4], 128  }
 0x37a   :  { %1198 = vsyncadd [#allocation4], 4294967168 }
 0x37b   :  { %838 = vsyncpa [#allocation3], 1 }
 0x37c   :  { %839 = vsyncpa [#allocation6], 1 }
 0x37d   :  { %840 = vsyncpa [#allocation4], 1 }

</bundles_post_ra>
